<compile_context>
chip_gen: v6e
topology: v6e:2x2x1
jax: 0.10.0
libtpu: 0.0.40
codegen_flags: <defaults>
</compile_context>

<pallas_src>
import functools

import jax
import jax.numpy as jnp
from jax.experimental import pallas as pl
from jax.experimental.pallas import tpu as pltpu


def _round_up(x: int, m: int) -> int:
    return ((x + m - 1) // m) * m


def _linear_kernel(x_ref, w_ref, b_ref, o_ref, acc_ref):
    # x_ref: (tile_b, tk)   w_ref: (tk, tn)   b_ref: (1, tn) f32
    # o_ref: (tile_b, tn)   acc_ref: (tile_b, tn) f32 scratch
    k = pl.program_id(2)

    @pl.when(k == 0)
    def _():
        acc_ref[...] = jnp.zeros_like(acc_ref)

    acc_ref[...] += jnp.dot(
        x_ref[...], w_ref[...], preferred_element_type=jnp.float32
    )

    @pl.when(k == pl.num_programs(2) - 1)
    def _():
        o_ref[...] = (acc_ref[...] + b_ref[...]).astype(o_ref.dtype)


def static_embedding_forward(
    x,
    weight_pt,
    bias,
    *,
    tile_b=None,
    tile_n=None,
    tile_k=None,
    compute_dtype=None,
):
    """nn.Linear forward.

    x:         (B, input_size)
    weight_pt: (output_size, input_size)  -- PyTorch nn.Linear layout
    bias:      (output_size,)
    compute_dtype: e.g. jnp.bfloat16 to run the MXU in bf16 (f32 accumulation kept);
                   None keeps the input dtype (exact f32 semantics).
    """
    B, K = x.shape
    N, K2 = weight_pt.shape
    assert K == K2, "weight in_features must match x last dim"
    assert bias.shape == (N,)

    out_dtype = x.dtype

    # Kernel consumes W in (K, N) layout; same math as nn.Linear (x @ W.T + b).
    # (In production, store the weight pre-transposed to avoid this XLA transpose.)
    w = weight_pt.T

    if compute_dtype is not None:
        x = x.astype(compute_dtype)
        w = w.astype(compute_dtype)
    op_dtype = x.dtype
    op_bytes = jnp.dtype(op_dtype).itemsize
    out_bytes = jnp.dtype(out_dtype).itemsize
    sub = 16 if op_bytes == 2 else 8  # sublane multiple (bf16 packs 2 rows/sublane)

    # ---- tile selection -------------------------------------------------------
    if tile_n is None:
        tile_n = min(_round_up(N, 128), 512)
    if tile_k is None:
        tile_k = 512
    if tile_b is None:
        tile_b = min(_round_up(B, sub), 256)
    # Respect the (8,128) block rule / vreg alignment.
    tile_b = _round_up(tile_b, sub)
    assert tile_n % 128 == 0, "tile_n must be a multiple of 128 (lane-dense output)"

    if K <= tile_k:
        tk = K          # full-K block: no divisibility constraint on a full dim
        K_pad = K
    else:
        assert tile_k % 128 == 0, "tile_k must be a multiple of 128 when tiling K"
        tk = tile_k
        K_pad = _round_up(K, tk)

    B_pad = _round_up(B, tile_b)
    N_pad = _round_up(N, tile_n)

    # ---- pad operands so every tile is full (zero padding is exact for matmul) ---
    if (B_pad, K_pad) != (B, K):
        x = jnp.pad(x, ((0, B_pad - B), (0, K_pad - K)))
    if (K_pad, N_pad) != (K, N):
        w = jnp.pad(w, ((0, K_pad - K), (0, N_pad - N)))
    bias2d = bias.astype(jnp.float32).reshape(1, N)
    if N_pad != N:
        bias2d = jnp.pad(bias2d, ((0, 0), (0, N_pad - N)))

    n_tiles = N_pad // tile_n
    b_tiles = B_pad // tile_b
    k_tiles = K_pad // tk
    grid = (n_tiles, b_tiles, k_tiles)

    # ---- VMEM budget (double-buffered in/out tiles + f32 accumulator) ------------
    vmem_needed = (
        2 * (tile_b * tk * op_bytes + tk * tile_n * op_bytes
             + tile_n * 4 + tile_b * tile_n * out_bytes)
        + tile_b * tile_n * 4
    )
    VMEM_CAP = 48 * 1024 * 1024  # headroom under v7x's 64 MiB physical VMEM
    assert vmem_needed <= VMEM_CAP, (
        f"tile config needs ~{vmem_needed/2**20:.1f} MiB VMEM; shrink tile_b/tile_n/tile_k"
    )
    vmem_limit = min(max(vmem_needed + (4 << 20), 32 << 20), 64 << 20)

    cost = pl.CostEstimate(
        flops=2 * B * K * N,
        transcendentals=0,
        bytes_accessed=B * K * op_bytes + K * N * op_bytes + N * 4 + B * N * out_bytes,
    )

    out_padded = pl.pallas_call(
        _linear_kernel,
        out_shape=jax.ShapeDtypeStruct((B_pad, N_pad), out_dtype),
        grid_spec=pltpu.PrefetchScalarGridSpec(
            num_scalar_prefetch=0,
            grid=grid,
            in_specs=[
                pl.BlockSpec((tile_b, tk), lambda j, i, k: (i, k)),   # x tile
                pl.BlockSpec((tk, tile_n), lambda j, i, k: (k, j)),   # weight tile
                pl.BlockSpec((1, tile_n), lambda j, i, k: (0, j)),    # bias tile
            ],
            out_specs=pl.BlockSpec((tile_b, tile_n), lambda j, i, k: (i, j)),
            scratch_shapes=[pltpu.VMEM((tile_b, tile_n), jnp.float32)],
        ),
        compiler_params=pltpu.CompilerParams(
            dimension_semantics=("parallel", "parallel", "arbitrary"),
            vmem_limit_bytes=vmem_limit,
        ),
        cost_estimate=cost,
    )(x, w, bias2d)

    if (B_pad, N_pad) != (B, N):
        out_padded = out_padded[:B, :N]
    return out_padded


if __name__ == "__main__":
    key = jax.random.PRNGKey(0)

    # ---- Case 1: multi-tile path (N / B / K tiling, accumulator, padding) -------
    B, K, N = 48, 160, 192
    kx, kw, kb = jax.random.split(key, 3)
    bound = 1.0 / jnp.sqrt(jnp.float32(K))
    w_pt = jax.random.uniform(kw, (N, K), jnp.float32, -bound, bound)
    b = jax.random.uniform(kb, (N,), jnp.float32, -bound, bound)
    x = jax.random.normal(kx, (B, K), jnp.float32)

    out = static_embedding_forward(x, w_pt, b, tile_b=16, tile_n=128, tile_k=128)
    out = jax.block_until_ready(out)
    ref = jnp.dot(x, w_pt.T, precision=jax.lax.Precision.HIGHEST) + b
    assert out.shape == (B, N)
    assert jnp.allclose(out, ref, atol=1e-4, rtol=1e-4)

    # ---- Case 2: demo-sized (8, 32 -> 64), default tiles, exact f32 path --------
    B2, K2, N2 = 8, 32, 64
    kx2, kw2, kb2 = jax.random.split(jax.random.PRNGKey(1), 3)
    bound2 = 1.0 / jnp.sqrt(jnp.float32(K2))
    w_pt2 = jax.random.uniform(kw2, (N2, K2), jnp.float32, -bound2, bound2)
    b2 = jax.random.uniform(kb2, (N2,), jnp.float32, -bound2, bound2)
    x2 = jax.random.normal(kx2, (B2, K2), jnp.float32)

    out2 = jax.block_until_ready(static_embedding_forward(x2, w_pt2, b2))
    ref2 = jnp.dot(x2, w_pt2.T, precision=jax.lax.Precision.HIGHEST) + b2
    assert out2.shape == (B2, N2)
    assert jnp.allclose(out2, ref2, atol=1e-5, rtol=1e-5)

    # ---- Case 3: bf16 operands (recommended on v6e/v7x), f32 accumulation -------
    out3 = jax.block_until_ready(
        static_embedding_forward(x2, w_pt2, b2, compute_dtype=jnp.bfloat16)
    )
    assert jnp.allclose(out3, ref2, atol=5e-2, rtol=5e-2)

    print("KERNEL_OK")
</pallas_src>

<mosaic_0001>
module attributes {stable_mosaic.version = 11 : i64} {
  func.func @_linear_kernel(%arg0: i32, %arg1: i32, %arg2: i32, %arg3: memref<16x128xf32, #tpu.memory_space<vmem>>, %arg4: memref<128x128xf32, #tpu.memory_space<vmem>>, %arg5: memref<1x128xf32, #tpu.memory_space<vmem>>, %arg6: memref<16x128xf32, #tpu.memory_space<vmem>>, %arg7: memref<16x128xf32, #tpu.memory_space<vmem>>) attributes {dimension_semantics = [#tpu.dimension_semantics<parallel>, #tpu.dimension_semantics<parallel>, #tpu.dimension_semantics<arbitrary>], iteration_bounds = array<i64: 2, 3, 2>, scalar_prefetch = 0 : i64, scratch_operands = 1 : i64, tpu.core_type = #tpu.core_type<tc>, window_params = [{transform_indices = @transform_0, window_bounds = array<i64: 16, 128>}, {transform_indices = @transform_1, window_bounds = array<i64: 128, 128>}, {transform_indices = @transform_2, window_bounds = array<i64: 1, 128>}, {transform_indices = @transform_3, window_bounds = array<i64: 16, 128>}]} {
    %c0_i32 = arith.constant 0 : i32
    %0 = arith.cmpi eq, %arg2, %c0_i32 : i32
    %1 = arith.extui %0 : i1 to i32
    %c0_i32_0 = arith.constant 0 : i32
    %2 = arith.cmpi ne, %1, %c0_i32_0 : i32
    scf.if %2 {
      %cst_9 = arith.constant 0.000000e+00 : f32
      %12 = vector.broadcast %cst_9 : f32 to vector<16x128xf32>
      %c0_10 = arith.constant 0 : index
      %c0_11 = arith.constant 0 : index
      %13 = vector.load %arg7[%c0_10, %c0_11] : memref<16x128xf32, #tpu.memory_space<vmem>>, vector<16x128xf32>
      tpu.vector_store %arg7[%c0_10, %c0_11], %12 {strides = array<i32>} : memref<16x128xf32, #tpu.memory_space<vmem>>, vector<16x128xf32>,
    } else {
    }
    %c0 = arith.constant 0 : index
    %c0_1 = arith.constant 0 : index
    %3 = vector.load %arg7[%c0, %c0_1] : memref<16x128xf32, #tpu.memory_space<vmem>>, vector<16x128xf32>
    %c0_2 = arith.constant 0 : index
    %c0_3 = arith.constant 0 : index
    %4 = vector.load %arg3[%c0_2, %c0_3] : memref<16x128xf32, #tpu.memory_space<vmem>>, vector<16x128xf32>
    %c0_4 = arith.constant 0 : index
    %c0_5 = arith.constant 0 : index
    %5 = vector.load %arg4[%c0_4, %c0_5] : memref<128x128xf32, #tpu.memory_space<vmem>>, vector<128x128xf32>
    %cst = arith.constant dense<0.000000e+00> : vector<16x128xf32>
    %6 = tpu.matmul %4, %5, %cst {dimension_numbers = #tpu.dot_dimension_numbers<[1], [0], [0], [1], [0, 0, 1, 1], [], []>} : vector<16x128xf32>, vector<128x128xf32>, vector<16x128xf32> -> vector<16x128xf32>
    %7 = arith.addf %3, %6 : vector<16x128xf32>
    %c0_6 = arith.constant 0 : index
    %c0_7 = arith.constant 0 : index
    %8 = vector.load %arg7[%c0_6, %c0_7] : memref<16x128xf32, #tpu.memory_space<vmem>>, vector<16x128xf32>
    tpu.vector_store %arg7[%c0_6, %c0_7], %7 {strides = array<i32>} : memref<16x128xf32, #tpu.memory_space<vmem>>, vector<16x128xf32>,
    %c1_i32 = arith.constant 1 : i32
    %9 = arith.cmpi eq, %arg2, %c1_i32 : i32
    %10 = arith.extui %9 : i1 to i32
    %c0_i32_8 = arith.constant 0 : i32
    %11 = arith.cmpi ne, %10, %c0_i32_8 : i32
    scf.if %11 {
      %c0_9 = arith.constant 0 : index
      %c0_10 = arith.constant 0 : index
      %12 = vector.load %arg7[%c0_9, %c0_10] : memref<16x128xf32, #tpu.memory_space<vmem>>, vector<16x128xf32>
      %c0_11 = arith.constant 0 : index
      %c0_12 = arith.constant 0 : index
      %13 = vector.load %arg5[%c0_11, %c0_12] : memref<1x128xf32, #tpu.memory_space<vmem>>, vector<1x128xf32>
      %14 = vector.broadcast %13 : vector<1x128xf32> to vector<16x128xf32>
      %15 = arith.addf %12, %14 : vector<16x128xf32>
      %c0_13 = arith.constant 0 : index
      %c0_14 = arith.constant 0 : index
      %16 = vector.load %arg6[%c0_13, %c0_14] : memref<16x128xf32, #tpu.memory_space<vmem>>, vector<16x128xf32>
      tpu.vector_store %arg6[%c0_13, %c0_14], %15 {strides = array<i32>} : memref<16x128xf32, #tpu.memory_space<vmem>>, vector<16x128xf32>,
    } else {
    }
    return
  }
  func.func @transform_0(%arg0: i32, %arg1: i32, %arg2: i32) -> (i32, i32) {
    %c0_i32 = arith.constant 0 : i32
    return %arg1, %arg2 : i32, i32
  }
  func.func @transform_1(%arg0: i32, %arg1: i32, %arg2: i32) -> (i32, i32) {
    %c0_i32 = arith.constant 0 : i32
    return %arg2, %arg0 : i32, i32
  }
  func.func @transform_2(%arg0: i32, %arg1: i32, %arg2: i32) -> (i32, i32) {
    %c0_i32 = arith.constant 0 : i32
    %c0_i32_0 = arith.constant 0 : i32
    return %c0_i32, %arg0 : i32, i32
  }
  func.func @transform_3(%arg0: i32, %arg1: i32, %arg2: i32) -> (i32, i32) {
    %c0_i32 = arith.constant 0 : i32
    return %arg1, %arg0 : i32, i32
  }
}

</mosaic_0001>

<bundles_post_ra>
// kernel: tpu_custom_call.1
= control target key start
LH: loop header
LB: loop body
LE: loop exit
PB: predicated region body
PF: predicated region fallthrough
CT: control target
= control target key end

     0   :  { %s1409_s0 = inlined_call_operand.hbm [shape: f32[48,256], index: 0, kind: input, shape index: {}]   ;;  %s1410_s1 = inlined_call_operand.hbm [shape: f32[256,256], index: 1, kind: input, shape index: {}]   ;;  %s1411_s2 = inlined_call_operand.vmem [shape: f32[1,256], index: 2, kind: input, shape index: {}]   ;;  %s1412_s3 = inlined_call_operand.hbm [shape: f32[48,256], index: 3, kind: output, shape index: {}]  }
   0x1   :  { %1428 = sst [smem:[#allocation20_spill]] %s1409_s0 }
   0x2   :  { %1429 = sst [smem:[#allocation21_spill]] %s1410_s1 }
   0x3   :  { %1430 = sst [smem:[#allocation22_spill]] %s1411_s2 }
   0x4   :  { %1431 = sst [smem:[#allocation23_spill]] %s1412_s3 }
   0x5   :  { %8 = vsyncpa [#allocation4], 0 }
   0x6   :  { %10 = vsyncpa [#allocation4 + $0x1], 0 }
   0x7   :  { %11 = vsyncpa [#allocation7], 0 }
   0x8   :  { %13 = vsyncpa [#allocation7 + $0x1], 0 }
   0x9   :  { %14 = vsyncpa [#allocation5], 0 }
   0xa   :  { %16 = vsyncpa [#allocation5 + $0x1], 0  ;;  %s1028_s12 = smov 0   ;;  %s1030_s13 = smov 0  }
   0xb   :  { %s1032_s14 = smov 0   ;;  %s1034_s15 = smov 0  }
   0xc   :  { %s1036_s16 = smov 0   ;;  %s1038_s17 = smov 0  }
   0xd   :  { %s1040_s18 = smov 0   ;;  %s1042_s19 = smov 0  }
   0xe   :  { %s1044_s20 = smov 0   ;;  %s1046_s21 = smov 0  }
   0xf   :  { %s1048_s22 = smov 0   ;;  %s1050_s23 = smov 0  }
  0x10   :  { %s1052_s24 = smov 0   ;;  %s1054_s25 = smov 0  }
  0x11   :  { %s1056_s26 = smov 0   ;;  %s1058_s27 = smov 0  }
  0x12 LB: > { %1432 = sst [smem:[#allocation12_spill]] %s964_s19  ;;  %s34_s28 = sadd.s32 1, %s984_s24  ;;  %s996_s27 = sphi %s1058_s27, %s22_s27   ;;  %s992_s26 = sphi %s1056_s26, %s1489_s26   ;;  %s988_s25 = sphi %s1054_s25, %s1488_s25   ;;  %s984_s24 = sphi %s1052_s24, %s1487_s24   ;;  %s980_s23 = sphi %s1050_s23, %s1486_s23   ;;  %s976_s22 = sphi %s1048_s22, %s1485_s22   ;;  %s972_s21 = sphi %s1046_s21, %s1484_s21   ;;  %s968_s20 = sphi %s1044_s20, %s1483_s20   ;;  %s964_s19 = sphi %s1042_s19, %s1482_s19   ;;  %s960_s18 = sphi %s1040_s18, %s1472_s18   ;;  %s956_s17 = sphi %s1038_s17, %s1481_s17   ;;  %s952_s16 = sphi %s1036_s16, %s1480_s16   ;;  %s948_s15 = sphi %s1034_s15, %s1479_s15   ;;  %s944_s14 = sphi %s1032_s14, %s1478_s14   ;;  %s940_s13 = sphi %s1030_s13, %s1477_s13   ;;  %s936_s12 = sphi %s1028_s12, %s1476_s12  }
  0x13   : > { %1433 = sst [smem:[#allocation13_spill]] %s972_s21  ;;  %p35_p0 = scmp.ge.s32.totalorder %s34_s28, 2 }
  0x14   : > { %1434 = sst [smem:[#allocation14_spill]] %s976_s22  ;;  %s37_s29 = sadd.s32 1, %s988_s25 }
  0x15   : > { %1435 = sst [smem:[#allocation15_spill]] %s980_s23  ;;  %s1413_s30 = sadd.s32 4294967295, %s996_s27  }
  0x16   : > { %s50_s4 = sadd.s32 1, %s968_s20  ;;  %s1491_s28 = smov (%p35_p0, %s34_s28), 0 }
  0x17   : > { %1436 = sst [smem:[#allocation16_spill]] %s1491_s28  ;;  %s1493_s29 = smov (!%p35_p0, %s37_s29), %s988_s25 }
  0x18   : > { %p57_p1 = scmp.ne.s32.totalorder %s968_s20, %s964_s19  ;;  %p1421_p2 = scmp.eq.s32.totalorder %s996_s27, 0 }
  0x19   : > { %p39_p3 = scmp.ge.s32.totalorder %s1493_s29, 3  ;;  %p63_p4 = scmp.ne.s32.totalorder %s964_s19, %s960_s18 }
  0x1a   : > { %s1122_s5 = ssub.s32 %s984_s24, %s1491_s28  ;;  %p1126_p5 = scmp.eq.s32.totalorder %s1413_s30, 0 }
  0x1b   : > { %s1133_s7 = scalar_select %p39_p3, 0, %s1493_s29  }
  0x1c   : > { %p1137_p6 = por %p1421_p2, %p57_p1  ;;  %p1143_p7 = por %p1126_p5, %p63_p4 }
  0x1d   : > { %1438 = sst [smem:[#allocation17_spill]] %s1133_s7  ;;  %s1149_s10 = ssub.s32 %s988_s25, %s1133_s7 }
  0x1e   : > { %s1440_s9 = scalar_select %p1143_p7, 1, 0 }
  0x1f   : > { %s47_s11 = sor.u32 %s1122_s5, %s1149_s10  ;;  %p1423_p8 = scmp.lt.s32.totalorder %s996_s27, 12 }
  0x20   : > { %1441 = sst [smem:[#allocation18_spill]] %s1440_s9  ;;  %p48_p9 = scmp.eq.s32.totalorder %s47_s11, 0 }
  0x21   : > { %s169_s18 = sand.u32 1, %s968_s20   ;;  %s566_s3 = sshll.u32 %s988_s25, 2 }
  0x22   : > { %s545_s30 = sshll.u32 %s169_s18, 4  ;;  %s179_s22 = sadd.s32 %s984_s24, %s566_s3 }
  0x23   : > { %s1156_s28 = scalar_select %p48_p9, %s968_s20, %s50_s4  }
  0x24   : > { %s173_s21 = scalar_lea.vmem [#allocation3], %s545_s30  ;;  %s548_s23 = sshll.u32 %s179_s22, 7 }
  0x25   : > { %s182_s2 = sshll.u32 %s173_s21, 4  ;;  %s1442_s0 = sld [smem:[#allocation20_spill]]  ;;  %s183_s2 = int_to_ptr.vmem [resolvable:$true] %s182_s2 }
  0x26   : > { %p1167_p10 = pnand %p1423_p8, %p1137_p6  ;;  %s170_s11 = scalar_lea.sflag [#allocation4], %s169_s18 }
  0x27   : > { %s789_s4 = scalar_lea.vmem %s183_s2, 256  ;;  %s998_s3 = smov [#allocation3]  }
  0x28   : > { %p778_p11 = pneg %p1167_p10  ;;  %p790_p12 = scmp.ne.s32.totalorder %s183_s2, %s789_s4 }
  0x29   : > { %s794_s21 = sshll.u32 %s998_s3, 4  ;;  %s795_s21 = int_to_ptr.vmem [resolvable:$false] %s794_s21 }
  0x2a   : > { %p792_p13 = pnand %p790_p12, %p778_p11  ;;  %s796_s22 = scalar_lea.vmem %s795_s21, 512 }
  0x2b   : > { %s181_s9 = scalar_lea.hbm %s1442_s0, %s548_s23  ;;  %p797_p1 = scmp.lt.s32.totalorder %s183_s2, %s795_s21 }
  0x2c   : > { %p793_p0 = pneg %p792_p13  ;;  %p798_p4 = scmp.lt.s32.totalorder %s796_s22, %s789_s4 }
  0x2e   : > { %p799_p9 = por %p798_p4, %p797_p1 }
  0x30   : > { %p800_p2 = pnand %p799_p9, %p793_p0 }
  0x32   : > { %803 = shalt.err (!%p800_p2)
}
  0x33   : > { %s1422_s1 = smov 256   ;;  %s1424_s19 = smov 128  }
  0x34   : > { %s1425_s23 = smov 8   ;;  %p553_p2 = scmp.ge.s32.totalorder %s996_s27, 1 }
  0x35   : > { %631 = dma.hbm_to_vmem [thread:$0]  (!%p1167_p10), %s181_s9, 256, %s183_s2, %s170_s11, %s1422_s1, %s1424_s19, %s1425_s23  }
  0x36   : > { %p219_p6 = scmp.lt.s32.totalorder %s996_s27, 13  ;;  %s1444_s30 = sadd.s32 4294967295, %s996_s27  }
  0x37   : > { %p1182_p11 = scmp.eq.s32.totalorder %s1444_s30, 11  ;;  %s542_s7 = sadd.s32 4294967294, %s996_s27  }
  0x38   : > { %p1186_p12 = pnand %p553_p2, %p219_p6  ;;  %s41_s4 = sadd.s32 1, %s992_s26 }
  0x39   : > { %s1495_s4 = smov (!%p39_p3, %s41_s4), %s992_s26  ;;  %s78_s2 = sadd.s32 1, %s956_s17 }
  0x3a   : > { %p91_p10 = scmp.ne.s32.totalorder %s952_s16, %s948_s15  ;;  %p43_p13 = scmp.ge.s32.totalorder %s1495_s4, 2 }
  0x3b   : > { %p85_p0 = scmp.ne.s32.totalorder %s956_s17, %s952_s16  ;;  %s132_s11 = sadd.s32 1, %s944_s14 }
  0x3c   : > { %p1202_p1 = por %p91_p10, %p1126_p5  ;;  %s1497_s4 = smov (%p43_p13, %s1495_s4), 0 }
  0x3d   : > { %1448 = sst [smem:[#allocation19_spill]] %s1497_s4  ;;  %p142_p3 = scmp.ne.s32.totalorder %s944_s14, %s940_s13 }
  0x3e   : > { %p148_p4 = scmp.ne.s32.totalorder %s940_s13, %s936_s12  ;;  %s74_s15 = ssub.s32 %s992_s26, %s1497_s4 }
  0x3f   : > { %p149_p9 = scmp.eq.s32.totalorder %s542_s7, 11  ;;  %s75_s29 = sor.u32 %s74_s15, %s1122_s5 }
  0x40   : > { %s129_s6 = sor.u32 %s74_s15, %s1149_s10  ;;  %p76_p2 = scmp.eq.s32.totalorder %s75_s29, 0 }
  0x41   : > { %p130_p5 = scmp.eq.s32.totalorder %s129_s6, 0  ;;  %p1219_p6 = por %p1182_p11, %p142_p3 }
  0x42   : > { %p1223_p10 = por %p149_p9, %p148_p4  ;;  %s192_s1 = sand.u32 1, %s956_s17  }
  0x43   : > { %s1449_s3 = scalar_select %p1219_p6, 1, 0 }
  0x44   : > { %s1450_s21 = scalar_select %p1223_p10, 1, 0 }
  0x45   : > { %s1228_s22 = scalar_select %p76_p2, %s956_s17, %s78_s2  }
  0x46   : > { %s1231_s30 = scalar_select %p130_p5, %s944_s14, %s132_s11  }
  0x47   : > { %s567_s7 = sshll.u32 %s984_s24, 5  ;;  %p1451_p13 = scmp.eq.s32.totalorder %s996_s27, 0 }
  0x48   : > { %s549_s5 = sshll.u32 %s192_s1, 7  ;;  %s202_s10 = sadd.s32 %s992_s26, %s567_s7 }
  0x49   : > { %p87_p8 = por %p85_p0, %p1451_p13  ;;  %s552_s8 = sshll.u32 %s202_s10, 7 }
  0x4a   : > { %s196_s15 = scalar_lea.vmem [#allocation6], %s549_s5  ;;  %s1452_s23 = sld [smem:[#allocation21_spill]] }
  0x4b   : > { %s205_s29 = sshll.u32 %s196_s15, 4  ;;  %p1453_p11 = scmp.lt.s32.totalorder %s996_s27, 12  ;;  %s206_s29 = int_to_ptr.vmem [resolvable:$true] %s205_s29 }
  0x4c   : > { %s193_s11 = scalar_lea.sflag [#allocation7], %s192_s1  ;;  %s817_s4 = scalar_lea.vmem %s206_s29, 2048 }
  0x4d   : > { %p1246_p3 = pnand %p1453_p11, %p87_p8  ;;  %p818_p0 = scmp.ne.s32.totalorder %s206_s29, %s817_s4 }
  0x4e   : > { %s1002_s7 = smov [#allocation6]  }
  0x4f   : > { %p806_p4 = pneg %p1246_p3  ;;  %s822_s5 = sshll.u32 %s1002_s7, 4  ;;  %s823_s5 = int_to_ptr.vmem [resolvable:$false] %s822_s5 }
  0x50   : > { %s204_s0 = scalar_lea.hbm %s1452_s23, %s552_s8  ;;  %s824_s10 = scalar_lea.vmem %s823_s5, 4096 }
  0x51   : > { %p820_p9 = pnand %p818_p0, %p806_p4  ;;  %p825_p5 = scmp.lt.s32.totalorder %s206_s29, %s823_s5 }
  0x52   : > { %p826_p13 = scmp.lt.s32.totalorder %s824_s10, %s817_s4 }
  0x53   : > { %p821_p2 = pneg %p820_p9 }
  0x54   : > { %p827_p10 = por %p826_p13, %p825_p5 }
  0x56   : > { %p828_p6 = pnand %p827_p10, %p821_p2 }
  0x58   : > { %831 = shalt.err (!%p828_p6)
}
  0x59   : > { %s1455_s19 = smov 8   ;;  %s1456_s23 = smov 128  }
  0x5a   : > { %s1457_s1 = smov 256   ;;  %223 = sbr.rel (%p1186_p12) target bundleno = 394 (0x18a), region = 32 }
  0x5b   : > { %634 = dma.hbm_to_vmem [thread:$0]  (!%p1246_p3), %s204_s0, 2048, %s206_s29, %s193_s11, %s1457_s1, %s1456_s23, %s1455_s19  }
  0x5c   : > { %s1458_s8 = sld [smem:[#allocation12_spill]] (!%p1186_p12) }
  0x62   : > { %s225_s6 = sand.u32 1, %s1458_s8  }
  0x63   : > { %s1260_s7 = sshll.u32 %s225_s6, 4  ;;  %s226_s5 = scalar_lea.sflag [#allocation4], %s225_s6 }
  0x64   : > { %s229_s4 = scalar_lea.vmem [#allocation3], %s1260_s7 }
  0x65   : > { %923 = dma.done.wait (%p1143_p7), %s226_s5, 256  }
  0x66   : > { %925 = vsyncadd (%p1143_p7), %s226_s5, 4294967040  ;;  %s234_s2 = sand.u32 1, %s952_s16  }
  0x67   : > { %s555_s0 = sshll.u32 %s234_s2, 7  ;;  %s235_s29 = scalar_lea.sflag [#allocation7], %s234_s2 }
  0x68   : > { %s1268_s18 = scalar_lea.vmem [#allocation6], %s555_s0 }
  0x69   : > { %927 = dma.done.wait (%p1202_p1), %s235_s29, 2048  }
  0x6a   : > { %929 = vsyncadd (%p1202_p1), %s235_s29, 4294965248  ;;  %s1460_s11 = sld [smem:[#allocation15_spill]]  ;;  %s266_s10 = sand.u32 1, %s940_s13  }
  0x6b   : > { %s556_s19 = sshll.u32 %s266_s10, 4  ;;  %s1461_s8 = sld [smem:[#allocation22_spill]] }
  0x6c   : > { %s1285_s6 = scalar_lea.vmem [#allocation8], %s556_s19  ;;  %s1462_s5 = sld [smem:[#allocation13_spill]] }
  0x70   : > { %p271_p8 = scmp.lt.s32.totalorder %s1460_s11, 1 }
  0x72   : > { %s1499_s11 = smov (!%p271_p8, %s1460_s11), 1  ;;  %p557_p7 = scmp.ne.s32.totalorder %s1462_s5, 0 }
  0x73   : > { %s273_s15 = scalar_lea.vmem %s1461_s8, %s1499_s11 }
  0x74   : > { %278 = sbr.rel (%p557_p7) target bundleno = 123 (0x7b), region = 44 }
  0x79   : > { %v1003_v0 = vmov 0.0  }
  0x7a   : > { %279 = vst [vmem:[#allocation2] sm:$0xff] %v1003_v0  ;;  %280 = vst [vmem:[#allocation2 + $0x8] sm:$0xff] %v1003_v0 }
  0x7b PF: > { %v300_v1 = vld [vmem:[%s1268_s18 + $0x78] sm:$0xff]  ;;  %v299_v2 = vld [vmem:[%s1268_s18 + $0x70] sm:$0xff]  ;;  %v298_v3 = vld [vmem:[%s1268_s18 + $0x68] sm:$0xff]  ;;  %s1463_s9 = sld [smem:[#allocation13_spill]] }
  0x7c   : > { %587 = vmatprep.subr.mxu0 %v300_v1  ;;  %v297_v4 = vld [vmem:[%s1268_s18 + $0x60] sm:$0xff]  ;;  %v296_v6 = vld [vmem:[%s1268_s18 + $0x58] sm:$0xff]  ;;  %v295_v7 = vld [vmem:[%s1268_s18 + $0x50] sm:$0xff] }
  0x7d   : > { %588 = vmatpush3.msra.mxu0 %v300_v1  ;;  %v283_v5 = vld [vmem:[%s229_s4] sm:$0xff]  ;;  %v294_v8 = vld [vmem:[%s1268_s18 + $0x48] sm:$0xff]  ;;  %v292_v10 = vld [vmem:[%s1268_s18 + $0x38] sm:$0xff] }
  0x7e   : > { %589 = vmatprep.subr.mxu0 %v299_v2  ;;  %619 = vmatprep.mubr.f32.mxu0 %v283_v5  ;;  %v293_v9 = vld [vmem:[%s1268_s18 + $0x40] sm:$0xff]  ;;  %v291_v11 = vld [vmem:[%s1268_s18 + $0x30] sm:$0xff]  ;;  %v290_v12 = vld [vmem:[%s1268_s18 + $0x28] sm:$0xff] }
  0x7f   : > { %590 = vmatpush3.msra.mxu0 %v299_v2  ;;  %v289_v13 = vld [vmem:[%s1268_s18 + $0x20] sm:$0xff]  ;;  %v288_v14 = vld [vmem:[%s1268_s18 + $0x18] sm:$0xff]  ;;  %v287_v15 = vld [vmem:[%s1268_s18 + $0x10] sm:$0xff] }
  0x80   : > { %591 = vmatprep.subr.mxu0 %v298_v3  ;;  %v286_v16 = vld [vmem:[%s1268_s18 + $0x8] sm:$0xff]  ;;  %v285_v17 = vld [vmem:[%s1268_s18] sm:$0xff] }
  0x81   : > { %592 = vmatpush3.msra.mxu0 %v298_v3  ;;  %v284_v18 = vld [vmem:[%s229_s4 + $0x8] sm:$0xff]  ;;  %v281_v21 = vld [vmem:[#allocation2] sm:$0xff]  ;;  %p558_p12 = scmp.ne.s32.totalorder %s1463_s9, 1 }
  0x82   : > { %593 = vmatprep.subr.mxu0 %v297_v4  ;;  %v282_v19 = vld [vmem:[#allocation2 + $0x8] sm:$0xff] }
  0x83   : > { %594 = vmatpush3.msra.mxu0 %v297_v4 }
  0x84   : > { %595 = vmatprep.subr.mxu0 %v296_v6 }
  0x85   : > { %596 = vmatpush3.msra.mxu0 %v296_v6 }
  0x86   : > { %597 = vmatprep.subr.mxu0 %v295_v7 }
  0x87   : > { %598 = vmatpush3.msra.mxu0 %v295_v7 }
  0x88   : > { %599 = vmatprep.subr.mxu0 %v294_v8 }
  0x89   : > { %600 = vmatpush3.msra.mxu0 %v294_v8 }
  0x8a   : > { %601 = vmatprep.subr.mxu0 %v293_v9 }
  0x8b   : > { %602 = vmatpush3.msra.mxu0 %v293_v9 }
  0x8c   : > { %603 = vmatprep.subr.mxu0 %v292_v10 }
  0x8d   : > { %604 = vmatpush3.msra.mxu0 %v292_v10 }
  0x8e   : > { %605 = vmatprep.subr.mxu0 %v291_v11 }
  0x8f   : > { %606 = vmatpush3.msra.mxu0 %v291_v11 }
  0x90   : > { %607 = vmatprep.subr.mxu0 %v290_v12 }
  0x91   : > { %608 = vmatpush3.msra.mxu0 %v290_v12 }
  0x92   : > { %609 = vmatprep.subr.mxu0 %v289_v13 }
  0x93   : > { %610 = vmatpush3.msra.mxu0 %v289_v13 }
  0x94   : > { %611 = vmatprep.subr.mxu0 %v288_v14 }
  0x95   : > { %612 = vmatpush3.msra.mxu0 %v288_v14 }
  0x96   : > { %613 = vmatprep.subr.mxu0 %v287_v15 }
  0x97   : > { %614 = vmatpush3.msra.mxu0 %v287_v15 }
  0x98   : > { %615 = vmatprep.subr.mxu0 %v286_v16 }
  0x99   : > { %616 = vmatpush3.msra.mxu0 %v286_v16 }
  0x9a   : > { %617 = vmatprep.subr.mxu0 %v285_v17 }
  0x9b   : > { %618 = vmatpush3.msra.mxu0 %v285_v17 }
  0x9c   : > { %620 = vmatmul.mubr.f32.vlgmr.msra.gmra.mxu0 %v284_v18 }
 0x15c   : > { %v621_v20 = vpop.f32.mrf.mxu0 }
 0x15d   : > { %v377_v22 = vadd.f32 %v621_v20, %v282_v19  ;;  %383 = sbr.rel (%p558_p12) target bundleno = 364 (0x16c), region = 48 }
 0x15e   : > { %v367_v23 = vpop.f32.mrf.mxu0 }
 0x15f   : > { %379 = vst [vmem:[#allocation2 + $0x8] sm:$0xff] %v377_v22  ;;  %v376_v24 = vadd.f32 %v367_v23, %v281_v21 }
 0x161   : > { %378 = vst [vmem:[#allocation2] sm:$0xff] %v376_v24 }
 0x162   : > { %v559_v26 = vld [vmem:[%s273_s15] ss:$0 sm:$0xff] }
 0x166   : > { %v385_v27 = vld [vmem:[#allocation2 + $0x8] sm:$0xff] }
 0x167   : > { %v394_v29 = vadd.f32 %v559_v26, %v385_v27 }
 0x168   : > { %v384_v25 = vld [vmem:[#allocation2] sm:$0xff] }
 0x169   : > { %v393_v28 = vadd.f32 %v559_v26, %v384_v25  ;;  %396 = vst [vmem:[%s1285_s6 + $0x8] sm:$0xff] %v394_v29 }
 0x16b   : > { %395 = vst [vmem:[%s1285_s6] sm:$0xff] %v393_v28 }
 0x16c PF: > { %s1465_s7 = sld [smem:[#allocation14_spill]]  ;;  %s413_s23 = sshll.u32 %s1285_s6, 4  ;;  %s1319_s23 = int_to_ptr.vmem [resolvable:$true] %s413_s23 }
 0x16d   : > { %s1466_s4 = sld [smem:[#allocation15_spill]]  ;;  %s1328_s2 = scalar_lea.sflag [#allocation5], %s266_s10 }
 0x16e   : > { %s1467_s15 = sld [smem:[#allocation23_spill]]  ;;  %s832_s0 = scalar_lea.vmem %s1319_s23, 256 }
 0x16f   : > { %p833_p1 = scmp.ne.s32.totalorder %s1319_s23, %s832_s0  ;;  %p1469_p6 = scmp.ne.s32.totalorder %s1449_s3, 0 }
 0x170   : > { %s1004_s6 = smov [#allocation8]  }
 0x171   : > { %p834_p10 = pnand %p833_p1, %p1469_p6  ;;  %s836_s29 = sshll.u32 %s1004_s6, 4  ;;  %s837_s29 = int_to_ptr.vmem [resolvable:$false] %s836_s29 }
 0x172   : > { %s568_s18 = sshll.u32 %s1465_s7, 2  ;;  %s838_s7 = scalar_lea.vmem %s837_s29, 512 }
 0x173   : > { %s410_s19 = sadd.s32 %s1466_s4, %s568_s18  ;;  %p835_p11 = pneg %p834_p10 }
 0x174   : > { %s563_s1 = sshll.u32 %s410_s19, 7  ;;  %s1468_s5 = smov %s1467_s15 }
 0x175   : > { %s1324_s9 = scalar_lea.hbm %s1467_s15, %s563_s1  ;;  %p839_p3 = scmp.lt.s32.totalorder %s1319_s23, %s837_s29 }
 0x176   : > { %p840_p4 = scmp.lt.s32.totalorder %s838_s7, %s832_s0 }
 0x178   : > { %p841_p0 = por %p840_p4, %p839_p3 }
 0x17a   : > { %p842_p9 = pnand %p841_p0, %p835_p11 }
 0x17c   : > { %845 = shalt.err (!%p842_p9)
}
 0x17d   : > { %s846_s10 = scalar_lea.hbm %s1324_s9, 256  ;;  %s850_s19 = scalar_lea.hbm %s1468_s5, 1536 }
 0x17e   : > { %p847_p2 = scmp.ne.s32.totalorder %s1324_s9, %s846_s10  ;;  %p851_p8 = scmp.lt.s32.totalorder %s1324_s9, %s1468_s5 }
 0x17f   : > { %p852_p7 = scmp.lt.s32.totalorder %s850_s19, %s846_s10 }
 0x180   : > { %p848_p5 = pnand %p847_p2, %p1469_p6 }
 0x181   : > { %p853_p12 = por %p852_p7, %p851_p8 }
 0x182   : > { %p849_p13 = pneg %p848_p5 }
 0x184   : > { %p854_p1 = pnand %p853_p12, %p849_p13 }
 0x186   : > { %857 = shalt.err (!%p854_p1)
}
 0x187   : > { %s1005_s8 = smov 128   ;;  %s1006_s15 = smov 256  }
 0x188   : > { %s1007_s0 = smov 8  }
 0x189   : > { %626 = dma.vmem_to_hbm [thread:$0]  (%p1469_p6), %s1319_s23, 256, %s1324_s9, %s1328_s2, %s1005_s8, %s1006_s15, %s1007_s0  }
 0x18a PF: > { %p640_p10 = scmp.ge.s32.totalorder %s996_s27, 2  ;;  %s428_s6 = sand.u32 1, %s936_s12  }
 0x18b   : > { %p1470_p11 = scmp.ne.s32.totalorder %s1450_s21, 0  ;;  %s429_s29 = scalar_lea.sflag [#allocation5], %s428_s6 }
 0x18d   : > { %p636_p3 = pnand %p640_p10, %p1470_p11 }
 0x18f   : > { %p637_p4 = pneg %p636_p3 }
 0x191   : > { %931 = dma.done.wait (%p637_p4), %s429_s29, 256  }
 0x192   : > { %933 = vsyncadd (%p637_p4), %s429_s29, 4294967040  ;;  %s22_s27 = sadd.s32 1, %s996_s27   ;;  %s1472_s18 = sld [smem:[#allocation12_spill]] }
 0x193   : > { %p1356_p0 = scmp.ge.s32.totalorder %s22_s27, 14   ;;  %s1473_s3 = sld [smem:[#allocation16_spill]] }
 0x194   : > { %s1474_s9 = sld [smem:[#allocation17_spill]]  ;;  %s1476_s12 = smov %s940_s13 }
 0x195   : > { %s1475_s2 = sld [smem:[#allocation19_spill]]  ;;  %s1477_s13 = smov %s944_s14 }
 0x196   : > { %s1478_s14 = smov %s1231_s30  ;;  %s1479_s15 = smov %s952_s16 }
 0x197   : > { %s1480_s16 = smov %s956_s17  ;;  %s1481_s17 = smov %s1228_s22 }
 0x198   : > { %s1482_s19 = smov %s968_s20  ;;  %s1483_s20 = smov %s1156_s28 }
 0x199   : > { %s1484_s21 = smov %s984_s24  ;;  %s1485_s22 = smov %s988_s25 }
 0x19a   : > { %s1486_s23 = smov %s992_s26  ;;  %s1487_s24 = smov %s1473_s3 }
 0x19b   : > { %s1488_s25 = smov %s1474_s9  ;;  %s1489_s26 = smov %s1475_s2 }
 0x19c   :  { %21 = sbr.rel (!%p1356_p0) target bundleno = 18 (0x12), region = 101 }
 0x1a1   :  { %434 = vsyncpa [#allocation4], 1 }
 0x1a2   :  { %436 = vsyncpa [#allocation4 + $0x1], 1 }
 0x1a3   :  { %437 = vsyncpa [#allocation7], 1 }
 0x1a4   :  { %439 = vsyncpa [#allocation7 + $0x1], 1 }
 0x1a5   :  { %440 = vsyncpa [#allocation5], 1 }
 0x1a6   :  { %442 = vsyncpa [#allocation5 + $0x1], 1 }

</bundles_post_ra>
